<compile_context>
chip_gen: v7x
topology: tpu7x:2x2x1
jax: 0.10.0
libtpu: 0.0.40
codegen_flags: <defaults>
</compile_context>

<pallas_src>
import functools

import jax
import jax.numpy as jnp
from jax.experimental import pallas as pl
from jax.experimental.pallas import tpu as pltpu


def _c_lmcl_kernel(emb_ref, w_ref, lab_v_ref, lab_s_ref, cen_hbm_ref,
                   prec_ref, loss_ref, cen_buf, cen_sem,
                   *, s, m, lamda, n_classes, n_feat):
    B = emb_ref.shape[0]
    CE_pad = w_ref.shape[1]          # padded class/feature dim (C == E)

    # ---- kick off the B center-row gather DMAs first so they overlap compute ----
    copies = []
    for b in range(B):
        idx = lab_s_ref[b]                                   # SMEM scalar label
        cp = pltpu.make_async_copy(cen_hbm_ref.at[idx],      # (E,) row in HBM
                                   cen_buf.at[b],            # (E,) row in VMEM
                                   cen_sem.at[b])
        cp.start()
        copies.append(cp)

    emb = emb_ref[...]               # (B, CE_pad) f32, zero-padded features
    w = w_ref[...]                   # (CE_pad, CE_pad) f32, zero-padded
    lab = lab_v_ref[...]             # (B, 1) i32

    col = jax.lax.broadcasted_iota(jnp.int32, (B, CE_pad), 1)      # class idx
    class_valid = col < n_classes                                  # (B, CE_pad)
    wcol = jax.lax.broadcasted_iota(jnp.int32, (1, CE_pad), 1)
    wcol_valid = wcol < n_feat                                     # (1, CE_pad)

    # Fold both normalization scales into the matmul output (no x_norm/w_norm).
    # (No eps, faithful to the unprotected torch.norm division in the reference.)
    row_nsq = jnp.sum(emb * emb, axis=1, keepdims=True)            # (B, 1)
    row_rs = jax.lax.rsqrt(row_nsq)
    col_nsq = jnp.sum(w * w, axis=0, keepdims=True)                # (1, CE_pad)
    col_nsq = col_nsq + jnp.where(wcol_valid, 0.0, 1.0)            # guard padded cols
    col_rs = jax.lax.rsqrt(col_nsq)

    xw = jnp.dot(emb, w, preferred_element_type=jnp.float32)       # (B, CE_pad)
    xw = xw * row_rs * col_rs                                      # == x_norm @ w_norm

    lab_mask = col == lab                                          # (B, CE_pad)

    # value = s * (xw - m * one_hot); padded class columns -> very negative.
    margin = jnp.where(lab_mask, jnp.float32(s * m), jnp.float32(0.0))
    value = jnp.where(class_valid, s * xw - margin, jnp.float32(-1e30))

    # CrossEntropyLoss(value, label), reduction='mean'
    vmax = jnp.max(value, axis=1, keepdims=True)                   # (B, 1)
    lse = jnp.log(jnp.sum(jnp.exp(value - vmax), axis=1, keepdims=True)) + vmax
    tgt_cos = jnp.sum(jnp.where(lab_mask, xw, 0.0), axis=1, keepdims=True)
    tgt_logit = s * (tgt_cos - m)                                  # value at label
    lmcl_loss = jnp.sum(lse - tgt_logit) / float(B)

    # accuracy @1 on `value` (margin-adjusted, as in the reference); first index
    # achieving the max (matches topk/argmax tie-breaking).
    pred = jnp.min(jnp.where(value == vmax, col, CE_pad), axis=1, keepdims=True)
    correct = (pred == lab).astype(jnp.float32)
    prec = jnp.sum(correct) * (100.0 / float(B))

    # center loss: MSE(features, centers[label]) with the gathered rows; fully
    # vectorized over (B, E). Wait on the DMAs only now (they ran under compute).
    for cp in copies:
        cp.wait()
    cen_rows = cen_buf[...]                                        # (B, E)
    d = emb[:, :n_feat] - cen_rows
    center_loss = jnp.sum(d * d) / float(B * n_feat)
    # TODO(synk): the in-place running update of self.centers inside
    # get_center_loss is training-time mutable host/numpy state and is not
    # reproduced here; it does not affect this forward call's return values.

    prec_ref[0, 0] = prec
    loss_ref[0, 0] = lmcl_loss + lamda * center_loss


def _round_up(x, n):
    return ((x + n - 1) // n) * n


def _pick_vmem_limit_bytes():
    """Generation-aware VMEM scoped limit: headroom on v7x, roomy on v5e/v6e."""
    cap = 128 * 1024 * 1024
    try:
        info = pltpu.get_tpu_info()
        cap = int(getattr(info, "vmem_capacity_bytes", cap))
    except Exception:
        pass
    return max(16 * 1024 * 1024, min(cap - 16 * 1024 * 1024, 100 * 1024 * 1024))


def c_lmcl_forward(embedding, weights, centers, label, *, s, m, lamda):
    """Returns (prec@1, lmcl_loss + lamda * center_loss), both f32 scalars."""
    B, E = embedding.shape
    C = weights.shape[0]
    assert C == E, "torch.matmul(x_norm, w_norm) in the reference requires C == E"

    # Lane-dense padding ONLY when needed (centers is never padded/copied).
    E_pad = _round_up(E, 128)
    C_pad = _round_up(C, 128)
    assert C_pad == E_pad

    emb_p = embedding.astype(jnp.float32)
    if E_pad != E:
        emb_p = jnp.pad(emb_p, ((0, 0), (0, E_pad - E)))
    w_p = weights.astype(jnp.float32)
    if C_pad != C or E_pad != E:
        w_p = jnp.pad(w_p, ((0, C_pad - C), (0, E_pad - E)))
    cen = centers.astype(jnp.float32)              # stays in HBM, unpadded

    lab1d = label.reshape(B).astype(jnp.int32)     # SMEM copy for DMA addressing
    lab2d = lab1d.reshape(B, 1)                    # VMEM copy for vector masks

    kernel = functools.partial(_c_lmcl_kernel, s=float(s), m=float(m),
                               lamda=float(lamda), n_classes=C, n_feat=E)

    cost = pl.CostEstimate(
        flops=2 * B * C_pad * E_pad
              + 6 * (B * E_pad + C_pad * E_pad + B * C_pad)
              + 3 * B * E,
        transcendentals=B * C_pad + B + E_pad,
        bytes_accessed=4 * (B * E_pad + C_pad * E_pad + B * E + 2 * B) + 8,
    )

    prec, loss = pl.pallas_call(
        kernel,
        out_shape=(
            jax.ShapeDtypeStruct((1, 1), jnp.float32),
            jax.ShapeDtypeStruct((1, 1), jnp.float32),
        ),
        in_specs=[
            pl.BlockSpec(memory_space=pltpu.MemorySpace.VMEM),   # embedding (padded)
            pl.BlockSpec(memory_space=pltpu.MemorySpace.VMEM),   # weights   (padded)
            pl.BlockSpec(memory_space=pltpu.MemorySpace.VMEM),   # labels (B,1)
            pl.BlockSpec(memory_space=pltpu.MemorySpace.SMEM),   # labels (B,)
            pl.BlockSpec(memory_space=pl.ANY),                   # centers (HBM)
        ],
        out_specs=(
            pl.BlockSpec(memory_space=pltpu.MemorySpace.SMEM),
            pl.BlockSpec(memory_space=pltpu.MemorySpace.SMEM),
        ),
        scratch_shapes=[
            pltpu.VMEM((B, E), jnp.float32),          # gathered center rows
            pltpu.SemaphoreType.DMA((B,)),            # one DMA sem per row
        ],
        compiler_params=pltpu.CompilerParams(
            vmem_limit_bytes=_pick_vmem_limit_bytes()),
        cost_estimate=cost,
    )(emb_p, w_p, lab2d, lab1d, cen)

    return prec[0, 0], loss[0, 0]


if __name__ == "__main__":
    # Module hyper-params (num_classes must equal embedding_size, see note above).
    embedding_size = 32
    num_classes = 32
    B = 8
    s_hp, m_hp, lamda_hp = 30.0, 0.35, 0.003

    key = jax.random.PRNGKey(0)
    k_emb, k_w, k_lab = jax.random.split(key, 3)

    embedding = jax.random.normal(k_emb, (B, embedding_size), dtype=jnp.float32)
    # kaiming_normal_ on (num_classes, embedding_size): std = sqrt(2 / fan_in)
    weights = jax.random.normal(k_w, (num_classes, embedding_size),
                                dtype=jnp.float32) * jnp.sqrt(2.0 / embedding_size)
    centers = jnp.zeros((num_classes, embedding_size), dtype=jnp.float32)
    label = jax.random.randint(k_lab, (B,), 0, num_classes, dtype=jnp.int32)

    prec, total_loss = c_lmcl_forward(embedding, weights, centers, label,
                                      s=s_hp, m=m_hp, lamda=lamda_hp)
    jax.block_until_ready((prec, total_loss))
    print("KERNEL_OK")
</pallas_src>

<mosaic_0001>
module attributes {stable_mosaic.version = 11 : i64} {
  func.func @_c_lmcl_kernel(%arg0: memref<8x128xf32, #tpu.memory_space<vmem>>, %arg1: memref<128x128xf32, #tpu.memory_space<vmem>>, %arg2: memref<8x1xi32, #tpu.memory_space<vmem>>, %arg3: memref<8xi32, #tpu.memory_space<smem>>, %arg4: memref<32x32xf32, #tpu.memory_space<any>>, %arg5: memref<1x1xf32, #tpu.memory_space<smem>>, %arg6: memref<1x1xf32, #tpu.memory_space<smem>>, %arg7: memref<8x32xf32, #tpu.memory_space<vmem>>, %arg8: memref<8x!tpu.dma_semaphore, #tpu.memory_space<semaphore_mem>>) attributes {dimension_semantics = [], scalar_prefetch = 0 : i64, scratch_operands = 2 : i64, tpu.core_type = #tpu.core_type<tc>} {
    %c0 = arith.constant 0 : index
    %0 = memref.load %arg3[%c0] : memref<8xi32, #tpu.memory_space<smem>>
    %c0_i32 = arith.constant 0 : i32
    %c0_i32_0 = arith.constant 0 : i32
    %c0_i32_1 = arith.constant 0 : i32
    %1 = tpu.memref_slice %arg4[%0, %c0_i32_1] : memref<32x32xf32, #tpu.memory_space<any>> -> memref<1x32xf32, #tpu.memory_space<any>>
    %2 = tpu.memref_squeeze %1 : memref<1x32xf32, #tpu.memory_space<any>> -> memref<32xf32, #tpu.memory_space<any>>
    %c0_i32_2 = arith.constant 0 : i32
    %3 = tpu.memref_slice %arg7[%c0_i32, %c0_i32_2] : memref<8x32xf32, #tpu.memory_space<vmem>> -> memref<1x32xf32, #tpu.memory_space<vmem>>
    %4 = tpu.memref_squeeze %3 : memref<1x32xf32, #tpu.memory_space<vmem>> -> memref<32xf32, #tpu.memory_space<vmem>>
    %5 = tpu.memref_slice %arg8[%c0_i32_0] : memref<8x!tpu.dma_semaphore, #tpu.memory_space<semaphore_mem>> -> memref<1x!tpu.dma_semaphore, #tpu.memory_space<semaphore_mem>>
    %6 = tpu.memref_squeeze %5 : memref<1x!tpu.dma_semaphore, #tpu.memory_space<semaphore_mem>> -> memref<!tpu.dma_semaphore, #tpu.memory_space<semaphore_mem>>
    tpu.enqueue_dma source(%2 : memref<32xf32, #tpu.memory_space<any>>) target(%4 : memref<32xf32, #tpu.memory_space<vmem>>) target_semaphore(%6 : memref<!tpu.dma_semaphore, #tpu.memory_space<semaphore_mem>>)
    %c1 = arith.constant 1 : index
    %7 = memref.load %arg3[%c1] : memref<8xi32, #tpu.memory_space<smem>>
    %c1_i32 = arith.constant 1 : i32
    %c1_i32_3 = arith.constant 1 : i32
    %c0_i32_4 = arith.constant 0 : i32
    %8 = tpu.memref_slice %arg4[%7, %c0_i32_4] : memref<32x32xf32, #tpu.memory_space<any>> -> memref<1x32xf32, #tpu.memory_space<any>>
    %9 = tpu.memref_squeeze %8 : memref<1x32xf32, #tpu.memory_space<any>> -> memref<32xf32, #tpu.memory_space<any>>
    %c0_i32_5 = arith.constant 0 : i32
    %10 = tpu.memref_slice %arg7[%c1_i32, %c0_i32_5] : memref<8x32xf32, #tpu.memory_space<vmem>> -> memref<1x32xf32, #tpu.memory_space<vmem>>
    %11 = tpu.memref_squeeze %10 : memref<1x32xf32, #tpu.memory_space<vmem>> -> memref<32xf32, #tpu.memory_space<vmem>>
    %12 = tpu.memref_slice %arg8[%c1_i32_3] : memref<8x!tpu.dma_semaphore, #tpu.memory_space<semaphore_mem>> -> memref<1x!tpu.dma_semaphore, #tpu.memory_space<semaphore_mem>>
    %13 = tpu.memref_squeeze %12 : memref<1x!tpu.dma_semaphore, #tpu.memory_space<semaphore_mem>> -> memref<!tpu.dma_semaphore, #tpu.memory_space<semaphore_mem>>
    tpu.enqueue_dma source(%9 : memref<32xf32, #tpu.memory_space<any>>) target(%11 : memref<32xf32, #tpu.memory_space<vmem>>) target_semaphore(%13 : memref<!tpu.dma_semaphore, #tpu.memory_space<semaphore_mem>>)
    %c2 = arith.constant 2 : index
    %14 = memref.load %arg3[%c2] : memref<8xi32, #tpu.memory_space<smem>>
    %c2_i32 = arith.constant 2 : i32
    %c2_i32_6 = arith.constant 2 : i32
    %c0_i32_7 = arith.constant 0 : i32
    %15 = tpu.memref_slice %arg4[%14, %c0_i32_7] : memref<32x32xf32, #tpu.memory_space<any>> -> memref<1x32xf32, #tpu.memory_space<any>>
    %16 = tpu.memref_squeeze %15 : memref<1x32xf32, #tpu.memory_space<any>> -> memref<32xf32, #tpu.memory_space<any>>
    %c0_i32_8 = arith.constant 0 : i32
    %17 = tpu.memref_slice %arg7[%c2_i32, %c0_i32_8] : memref<8x32xf32, #tpu.memory_space<vmem>> -> memref<1x32xf32, #tpu.memory_space<vmem>>
    %18 = tpu.memref_squeeze %17 : memref<1x32xf32, #tpu.memory_space<vmem>> -> memref<32xf32, #tpu.memory_space<vmem>>
    %19 = tpu.memref_slice %arg8[%c2_i32_6] : memref<8x!tpu.dma_semaphore, #tpu.memory_space<semaphore_mem>> -> memref<1x!tpu.dma_semaphore, #tpu.memory_space<semaphore_mem>>
    %20 = tpu.memref_squeeze %19 : memref<1x!tpu.dma_semaphore, #tpu.memory_space<semaphore_mem>> -> memref<!tpu.dma_semaphore, #tpu.memory_space<semaphore_mem>>
    tpu.enqueue_dma source(%16 : memref<32xf32, #tpu.memory_space<any>>) target(%18 : memref<32xf32, #tpu.memory_space<vmem>>) target_semaphore(%20 : memref<!tpu.dma_semaphore, #tpu.memory_space<semaphore_mem>>)
    %c3 = arith.constant 3 : index
    %21 = memref.load %arg3[%c3] : memref<8xi32, #tpu.memory_space<smem>>
    %c3_i32 = arith.constant 3 : i32
    %c3_i32_9 = arith.constant 3 : i32
    %c0_i32_10 = arith.constant 0 : i32
    %22 = tpu.memref_slice %arg4[%21, %c0_i32_10] : memref<32x32xf32, #tpu.memory_space<any>> -> memref<1x32xf32, #tpu.memory_space<any>>
    %23 = tpu.memref_squeeze %22 : memref<1x32xf32, #tpu.memory_space<any>> -> memref<32xf32, #tpu.memory_space<any>>
    %c0_i32_11 = arith.constant 0 : i32
    %24 = tpu.memref_slice %arg7[%c3_i32, %c0_i32_11] : memref<8x32xf32, #tpu.memory_space<vmem>> -> memref<1x32xf32, #tpu.memory_space<vmem>>
    %25 = tpu.memref_squeeze %24 : memref<1x32xf32, #tpu.memory_space<vmem>> -> memref<32xf32, #tpu.memory_space<vmem>>
    %26 = tpu.memref_slice %arg8[%c3_i32_9] : memref<8x!tpu.dma_semaphore, #tpu.memory_space<semaphore_mem>> -> memref<1x!tpu.dma_semaphore, #tpu.memory_space<semaphore_mem>>
    %27 = tpu.memref_squeeze %26 : memref<1x!tpu.dma_semaphore, #tpu.memory_space<semaphore_mem>> -> memref<!tpu.dma_semaphore, #tpu.memory_space<semaphore_mem>>
    tpu.enqueue_dma source(%23 : memref<32xf32, #tpu.memory_space<any>>) target(%25 : memref<32xf32, #tpu.memory_space<vmem>>) target_semaphore(%27 : memref<!tpu.dma_semaphore, #tpu.memory_space<semaphore_mem>>)
    %c4 = arith.constant 4 : index
    %28 = memref.load %arg3[%c4] : memref<8xi32, #tpu.memory_space<smem>>
    %c4_i32 = arith.constant 4 : i32
    %c4_i32_12 = arith.constant 4 : i32
    %c0_i32_13 = arith.constant 0 : i32
    %29 = tpu.memref_slice %arg4[%28, %c0_i32_13] : memref<32x32xf32, #tpu.memory_space<any>> -> memref<1x32xf32, #tpu.memory_space<any>>
    %30 = tpu.memref_squeeze %29 : memref<1x32xf32, #tpu.memory_space<any>> -> memref<32xf32, #tpu.memory_space<any>>
    %c0_i32_14 = arith.constant 0 : i32
    %31 = tpu.memref_slice %arg7[%c4_i32, %c0_i32_14] : memref<8x32xf32, #tpu.memory_space<vmem>> -> memref<1x32xf32, #tpu.memory_space<vmem>>
    %32 = tpu.memref_squeeze %31 : memref<1x32xf32, #tpu.memory_space<vmem>> -> memref<32xf32, #tpu.memory_space<vmem>>
    %33 = tpu.memref_slice %arg8[%c4_i32_12] : memref<8x!tpu.dma_semaphore, #tpu.memory_space<semaphore_mem>> -> memref<1x!tpu.dma_semaphore, #tpu.memory_space<semaphore_mem>>
    %34 = tpu.memref_squeeze %33 : memref<1x!tpu.dma_semaphore, #tpu.memory_space<semaphore_mem>> -> memref<!tpu.dma_semaphore, #tpu.memory_space<semaphore_mem>>
    tpu.enqueue_dma source(%30 : memref<32xf32, #tpu.memory_space<any>>) target(%32 : memref<32xf32, #tpu.memory_space<vmem>>) target_semaphore(%34 : memref<!tpu.dma_semaphore, #tpu.memory_space<semaphore_mem>>)
    %c5 = arith.constant 5 : index
    %35 = memref.load %arg3[%c5] : memref<8xi32, #tpu.memory_space<smem>>
    %c5_i32 = arith.constant 5 : i32
    %c5_i32_15 = arith.constant 5 : i32
    %c0_i32_16 = arith.constant 0 : i32
    %36 = tpu.memref_slice %arg4[%35, %c0_i32_16] : memref<32x32xf32, #tpu.memory_space<any>> -> memref<1x32xf32, #tpu.memory_space<any>>
    %37 = tpu.memref_squeeze %36 : memref<1x32xf32, #tpu.memory_space<any>> -> memref<32xf32, #tpu.memory_space<any>>
    %c0_i32_17 = arith.constant 0 : i32
    %38 = tpu.memref_slice %arg7[%c5_i32, %c0_i32_17] : memref<8x32xf32, #tpu.memory_space<vmem>> -> memref<1x32xf32, #tpu.memory_space<vmem>>
    %39 = tpu.memref_squeeze %38 : memref<1x32xf32, #tpu.memory_space<vmem>> -> memref<32xf32, #tpu.memory_space<vmem>>
    %40 = tpu.memref_slice %arg8[%c5_i32_15] : memref<8x!tpu.dma_semaphore, #tpu.memory_space<semaphore_mem>> -> memref<1x!tpu.dma_semaphore, #tpu.memory_space<semaphore_mem>>
    %41 = tpu.memref_squeeze %40 : memref<1x!tpu.dma_semaphore, #tpu.memory_space<semaphore_mem>> -> memref<!tpu.dma_semaphore, #tpu.memory_space<semaphore_mem>>
    tpu.enqueue_dma source(%37 : memref<32xf32, #tpu.memory_space<any>>) target(%39 : memref<32xf32, #tpu.memory_space<vmem>>) target_semaphore(%41 : memref<!tpu.dma_semaphore, #tpu.memory_space<semaphore_mem>>)
    %c6 = arith.constant 6 : index
    %42 = memref.load %arg3[%c6] : memref<8xi32, #tpu.memory_space<smem>>
    %c6_i32 = arith.constant 6 : i32
    %c6_i32_18 = arith.constant 6 : i32
    %c0_i32_19 = arith.constant 0 : i32
    %43 = tpu.memref_slice %arg4[%42, %c0_i32_19] : memref<32x32xf32, #tpu.memory_space<any>> -> memref<1x32xf32, #tpu.memory_space<any>>
    %44 = tpu.memref_squeeze %43 : memref<1x32xf32, #tpu.memory_space<any>> -> memref<32xf32, #tpu.memory_space<any>>
    %c0_i32_20 = arith.constant 0 : i32
    %45 = tpu.memref_slice %arg7[%c6_i32, %c0_i32_20] : memref<8x32xf32, #tpu.memory_space<vmem>> -> memref<1x32xf32, #tpu.memory_space<vmem>>
    %46 = tpu.memref_squeeze %45 : memref<1x32xf32, #tpu.memory_space<vmem>> -> memref<32xf32, #tpu.memory_space<vmem>>
    %47 = tpu.memref_slice %arg8[%c6_i32_18] : memref<8x!tpu.dma_semaphore, #tpu.memory_space<semaphore_mem>> -> memref<1x!tpu.dma_semaphore, #tpu.memory_space<semaphore_mem>>
    %48 = tpu.memref_squeeze %47 : memref<1x!tpu.dma_semaphore, #tpu.memory_space<semaphore_mem>> -> memref<!tpu.dma_semaphore, #tpu.memory_space<semaphore_mem>>
    tpu.enqueue_dma source(%44 : memref<32xf32, #tpu.memory_space<any>>) target(%46 : memref<32xf32, #tpu.memory_space<vmem>>) target_semaphore(%48 : memref<!tpu.dma_semaphore, #tpu.memory_space<semaphore_mem>>)
    %c7 = arith.constant 7 : index
    %49 = memref.load %arg3[%c7] : memref<8xi32, #tpu.memory_space<smem>>
    %c7_i32 = arith.constant 7 : i32
    %c7_i32_21 = arith.constant 7 : i32
    %c0_i32_22 = arith.constant 0 : i32
    %50 = tpu.memref_slice %arg4[%49, %c0_i32_22] : memref<32x32xf32, #tpu.memory_space<any>> -> memref<1x32xf32, #tpu.memory_space<any>>
    %51 = tpu.memref_squeeze %50 : memref<1x32xf32, #tpu.memory_space<any>> -> memref<32xf32, #tpu.memory_space<any>>
    %c0_i32_23 = arith.constant 0 : i32
    %52 = tpu.memref_slice %arg7[%c7_i32, %c0_i32_23] : memref<8x32xf32, #tpu.memory_space<vmem>> -> memref<1x32xf32, #tpu.memory_space<vmem>>
    %53 = tpu.memref_squeeze %52 : memref<1x32xf32, #tpu.memory_space<vmem>> -> memref<32xf32, #tpu.memory_space<vmem>>
    %54 = tpu.memref_slice %arg8[%c7_i32_21] : memref<8x!tpu.dma_semaphore, #tpu.memory_space<semaphore_mem>> -> memref<1x!tpu.dma_semaphore, #tpu.memory_space<semaphore_mem>>
    %55 = tpu.memref_squeeze %54 : memref<1x!tpu.dma_semaphore, #tpu.memory_space<semaphore_mem>> -> memref<!tpu.dma_semaphore, #tpu.memory_space<semaphore_mem>>
    tpu.enqueue_dma source(%51 : memref<32xf32, #tpu.memory_space<any>>) target(%53 : memref<32xf32, #tpu.memory_space<vmem>>) target_semaphore(%55 : memref<!tpu.dma_semaphore, #tpu.memory_space<semaphore_mem>>)
    %c0_24 = arith.constant 0 : index
    %c0_25 = arith.constant 0 : index
    %56 = vector.load %arg0[%c0_24, %c0_25] : memref<8x128xf32, #tpu.memory_space<vmem>>, vector<8x128xf32>
    %c0_26 = arith.constant 0 : index
    %c0_27 = arith.constant 0 : index
    %57 = vector.load %arg1[%c0_26, %c0_27] : memref<128x128xf32, #tpu.memory_space<vmem>>, vector<128x128xf32>
    %c0_28 = arith.constant 0 : index
    %c0_29 = arith.constant 0 : index
    %58 = vector.load %arg2[%c0_28, %c0_29] : memref<8x1xi32, #tpu.memory_space<vmem>>, vector<8x1xi32>
    %59 = tpu.iota {dimensions = array<i32: 1>} : vector<8x128xi32>
    %c32_i32 = arith.constant 32 : i32
    %60 = vector.broadcast %c32_i32 : i32 to vector<8x128xi32>
    %61 = arith.cmpi slt, %59, %60 : vector<8x128xi32>
    %62 = tpu.iota {dimensions = array<i32: 1>} : vector<1x128xi32>
    %c32_i32_30 = arith.constant 32 : i32
    %63 = vector.broadcast %c32_i32_30 : i32 to vector<1x128xi32>
    %64 = arith.cmpi slt, %62, %63 : vector<1x128xi32>
    %65 = arith.mulf %56, %56 : vector<8x128xf32>
    %cst = arith.constant dense<0.000000e+00> : vector<8xf32>
    %66 = vector.multi_reduction <add>, %65, %cst [1] : vector<8x128xf32> to vector<8xf32>
    %67 = vector.shape_cast %66 : vector<8xf32> to vector<8x1xf32>
    %68 = math.rsqrt %67 : vector<8x1xf32>
    %69 = arith.mulf %57, %57 : vector<128x128xf32>
    %cst_31 = arith.constant dense<0.000000e+00> : vector<128xf32>
    %70 = vector.multi_reduction <add>, %69, %cst_31 [0] : vector<128x128xf32> to vector<128xf32>
    %71 = vector.shape_cast %70 : vector<128xf32> to vector<1x128xf32>
    %cst_32 = arith.constant 0.000000e+00 : f32
    %cst_33 = arith.constant 1.000000e+00 : f32
    %72 = vector.broadcast %cst_32 : f32 to vector<1x128xf32>
    %73 = vector.broadcast %cst_33 : f32 to vector<1x128xf32>
    %74 = arith.select %64, %72, %73 : vector<1x128xi1>, vector<1x128xf32>
    %75 = arith.addf %71, %74 : vector<1x128xf32>
    %76 = math.rsqrt %75 : vector<1x128xf32>
    %cst_34 = arith.constant dense<0.000000e+00> : vector<8x128xf32>
    %77 = tpu.matmul %56, %57, %cst_34 {dimension_numbers = #tpu.dot_dimension_numbers<[1], [0], [0], [1], [0, 0, 1, 1], [], []>} : vector<8x128xf32>, vector<128x128xf32>, vector<8x128xf32> -> vector<8x128xf32>
    %78 = vector.broadcast %68 : vector<8x1xf32> to vector<8x128xf32>
    %79 = arith.mulf %77, %78 : vector<8x128xf32>
    %80 = vector.broadcast %76 : vector<1x128xf32> to vector<8x128xf32>
    %81 = arith.mulf %79, %80 : vector<8x128xf32>
    %82 = vector.broadcast %58 : vector<8x1xi32> to vector<8x128xi32>
    %83 = arith.cmpi eq, %59, %82 : vector<8x128xi32>
    %cst_35 = arith.constant 1.050000e+01 : f32
    %cst_36 = arith.constant 0.000000e+00 : f32
    %84 = vector.broadcast %cst_35 : f32 to vector<8x128xf32>
    %85 = vector.broadcast %cst_36 : f32 to vector<8x128xf32>
    %86 = arith.select %83, %84, %85 : vector<8x128xi1>, vector<8x128xf32>
    %cst_37 = arith.constant 3.000000e+01 : f32
    %87 = vector.broadcast %cst_37 : f32 to vector<8x128xf32>
    %88 = arith.mulf %87, %81 : vector<8x128xf32>
    %89 = arith.subf %88, %86 : vector<8x128xf32>
    %cst_38 = arith.constant -1.000000e+30 : f32
    %90 = vector.broadcast %cst_38 : f32 to vector<8x128xf32>
    %91 = arith.select %61, %89, %90 : vector<8x128xi1>, vector<8x128xf32>
    %cst_39 = arith.constant dense<0xFF800000> : vector<8xf32>
    %92 = vector.multi_reduction <maximumf>, %91, %cst_39 [1] : vector<8x128xf32> to vector<8xf32>
    %93 = vector.shape_cast %92 : vector<8xf32> to vector<8x1xf32>
    %94 = vector.broadcast %93 : vector<8x1xf32> to vector<8x128xf32>
    %95 = arith.subf %91, %94 : vector<8x128xf32>
    %96 = math.exp %95 : vector<8x128xf32>
    %cst_40 = arith.constant dense<0.000000e+00> : vector<8xf32>
    %97 = vector.multi_reduction <add>, %96, %cst_40 [1] : vector<8x128xf32> to vector<8xf32>
    %98 = vector.shape_cast %97 : vector<8xf32> to vector<8x1xf32>
    %99 = math.log %98 : vector<8x1xf32>
    %100 = arith.addf %99, %93 : vector<8x1xf32>
    %cst_41 = arith.constant 0.000000e+00 : f32
    %101 = vector.broadcast %cst_41 : f32 to vector<8x128xf32>
    %102 = arith.select %83, %81, %101 : vector<8x128xi1>, vector<8x128xf32>
    %cst_42 = arith.constant dense<0.000000e+00> : vector<8xf32>
    %103 = vector.multi_reduction <add>, %102, %cst_42 [1] : vector<8x128xf32> to vector<8xf32>
    %104 = vector.shape_cast %103 : vector<8xf32> to vector<8x1xf32>
    %cst_43 = arith.constant 3.500000e-01 : f32
    %105 = vector.broadcast %cst_43 : f32 to vector<8x1xf32>
    %106 = arith.subf %104, %105 : vector<8x1xf32>
    %cst_44 = arith.constant 3.000000e+01 : f32
    %107 = vector.broadcast %cst_44 : f32 to vector<8x1xf32>
    %108 = arith.mulf %107, %106 : vector<8x1xf32>
    %109 = arith.subf %100, %108 : vector<8x1xf32>
    %110 = vector.shape_cast %109 : vector<8x1xf32> to vector<1x8x1xf32>
    %cst_45 = arith.constant dense<0.000000e+00> : vector<1xf32>
    %111 = vector.multi_reduction <add>, %110, %cst_45 [1, 2] : vector<1x8x1xf32> to vector<1xf32>
    %112 = vector.shape_cast %111 : vector<1xf32> to vector<1x1x1xf32>
    %113 = vector.extract %112[0, 0, 0] : f32 from vector<1x1x1xf32>
    %cst_46 = arith.constant 8.000000e+00 : f32
    %114 = arith.divf %113, %cst_46 : f32
    %115 = vector.broadcast %93 : vector<8x1xf32> to vector<8x128xf32>
    %116 = arith.cmpf oeq, %91, %115 : vector<8x128xf32>
    %c128_i32 = arith.constant 128 : i32
    %117 = vector.broadcast %c128_i32 : i32 to vector<8x128xi32>
    %118 = arith.select %116, %59, %117 : vector<8x128xi1>, vector<8x128xi32>
    %cst_47 = arith.constant dense<2147483647> : vector<8xi32>
    %119 = vector.multi_reduction <minsi>, %118, %cst_47 [1] : vector<8x128xi32> to vector<8xi32>
    %120 = vector.shape_cast %119 : vector<8xi32> to vector<8x1xi32>
    %121 = arith.cmpi eq, %120, %58 : vector<8x1xi32>
    %122 = arith.extui %121 : vector<8x1xi1> to vector<8x1xi32>
    %123 = arith.sitofp %122 : vector<8x1xi32> to vector<8x1xf32>
    %124 = vector.shape_cast %123 : vector<8x1xf32> to vector<1x8x1xf32>
    %cst_48 = arith.constant dense<0.000000e+00> : vector<1xf32>
    %125 = vector.multi_reduction <add>, %124, %cst_48 [1, 2] : vector<1x8x1xf32> to vector<1xf32>
    %126 = vector.shape_cast %125 : vector<1xf32> to vector<1x1x1xf32>
    %127 = vector.extract %126[0, 0, 0] : f32 from vector<1x1x1xf32>
    %cst_49 = arith.constant 1.250000e+01 : f32
    %128 = arith.mulf %127, %cst_49 : f32
    %c0_i32_50 = arith.constant 0 : i32
    %c0_i32_51 = arith.constant 0 : i32
    %c0_i32_52 = arith.constant 0 : i32
    %129 = tpu.memref_slice %arg4[%0, %c0_i32_52] : memref<32x32xf32, #tpu.memory_space<any>> -> memref<1x32xf32, #tpu.memory_space<any>>
    %130 = tpu.memref_squeeze %129 : memref<1x32xf32, #tpu.memory_space<any>> -> memref<32xf32, #tpu.memory_space<any>>
    %c0_i32_53 = arith.constant 0 : i32
    %131 = tpu.memref_slice %arg7[%c0_i32_50, %c0_i32_53] : memref<8x32xf32, #tpu.memory_space<vmem>> -> memref<1x32xf32, #tpu.memory_space<vmem>>
    %132 = tpu.memref_squeeze %131 : memref<1x32xf32, #tpu.memory_space<vmem>> -> memref<32xf32, #tpu.memory_space<vmem>>
    %133 = tpu.memref_slice %arg8[%c0_i32_51] : memref<8x!tpu.dma_semaphore, #tpu.memory_space<semaphore_mem>> -> memref<1x!tpu.dma_semaphore, #tpu.memory_space<semaphore_mem>>
    %134 = tpu.memref_squeeze %133 : memref<1x!tpu.dma_semaphore, #tpu.memory_space<semaphore_mem>> -> memref<!tpu.dma_semaphore, #tpu.memory_space<semaphore_mem>>
    tpu.wait_dma2 semaphore(%134 : memref<!tpu.dma_semaphore, #tpu.memory_space<semaphore_mem>>) src(%130 : memref<32xf32, #tpu.memory_space<any>>) dst(%132 : memref<32xf32, #tpu.memory_space<vmem>>)
    %c1_i32_54 = arith.constant 1 : i32
    %c1_i32_55 = arith.constant 1 : i32
    %c0_i32_56 = arith.constant 0 : i32
    %135 = tpu.memref_slice %arg4[%7, %c0_i32_56] : memref<32x32xf32, #tpu.memory_space<any>> -> memref<1x32xf32, #tpu.memory_space<any>>
    %136 = tpu.memref_squeeze %135 : memref<1x32xf32, #tpu.memory_space<any>> -> memref<32xf32, #tpu.memory_space<any>>
    %c0_i32_57 = arith.constant 0 : i32
    %137 = tpu.memref_slice %arg7[%c1_i32_54, %c0_i32_57] : memref<8x32xf32, #tpu.memory_space<vmem>> -> memref<1x32xf32, #tpu.memory_space<vmem>>
    %138 = tpu.memref_squeeze %137 : memref<1x32xf32, #tpu.memory_space<vmem>> -> memref<32xf32, #tpu.memory_space<vmem>>
    %139 = tpu.memref_slice %arg8[%c1_i32_55] : memref<8x!tpu.dma_semaphore, #tpu.memory_space<semaphore_mem>> -> memref<1x!tpu.dma_semaphore, #tpu.memory_space<semaphore_mem>>
    %140 = tpu.memref_squeeze %139 : memref<1x!tpu.dma_semaphore, #tpu.memory_space<semaphore_mem>> -> memref<!tpu.dma_semaphore, #tpu.memory_space<semaphore_mem>>
    tpu.wait_dma2 semaphore(%140 : memref<!tpu.dma_semaphore, #tpu.memory_space<semaphore_mem>>) src(%136 : memref<32xf32, #tpu.memory_space<any>>) dst(%138 : memref<32xf32, #tpu.memory_space<vmem>>)
    %c2_i32_58 = arith.constant 2 : i32
    %c2_i32_59 = arith.constant 2 : i32
    %c0_i32_60 = arith.constant 0 : i32
    %141 = tpu.memref_slice %arg4[%14, %c0_i32_60] : memref<32x32xf32, #tpu.memory_space<any>> -> memref<1x32xf32, #tpu.memory_space<any>>
    %142 = tpu.memref_squeeze %141 : memref<1x32xf32, #tpu.memory_space<any>> -> memref<32xf32, #tpu.memory_space<any>>
    %c0_i32_61 = arith.constant 0 : i32
    %143 = tpu.memref_slice %arg7[%c2_i32_58, %c0_i32_61] : memref<8x32xf32, #tpu.memory_space<vmem>> -> memref<1x32xf32, #tpu.memory_space<vmem>>
    %144 = tpu.memref_squeeze %143 : memref<1x32xf32, #tpu.memory_space<vmem>> -> memref<32xf32, #tpu.memory_space<vmem>>
    %145 = tpu.memref_slice %arg8[%c2_i32_59] : memref<8x!tpu.dma_semaphore, #tpu.memory_space<semaphore_mem>> -> memref<1x!tpu.dma_semaphore, #tpu.memory_space<semaphore_mem>>
    %146 = tpu.memref_squeeze %145 : memref<1x!tpu.dma_semaphore, #tpu.memory_space<semaphore_mem>> -> memref<!tpu.dma_semaphore, #tpu.memory_space<semaphore_mem>>
    tpu.wait_dma2 semaphore(%146 : memref<!tpu.dma_semaphore, #tpu.memory_space<semaphore_mem>>) src(%142 : memref<32xf32, #tpu.memory_space<any>>) dst(%144 : memref<32xf32, #tpu.memory_space<vmem>>)
    %c3_i32_62 = arith.constant 3 : i32
    %c3_i32_63 = arith.constant 3 : i32
    %c0_i32_64 = arith.constant 0 : i32
    %147 = tpu.memref_slice %arg4[%21, %c0_i32_64] : memref<32x32xf32, #tpu.memory_space<any>> -> memref<1x32xf32, #tpu.memory_space<any>>
    %148 = tpu.memref_squeeze %147 : memref<1x32xf32, #tpu.memory_space<any>> -> memref<32xf32, #tpu.memory_space<any>>
    %c0_i32_65 = arith.constant 0 : i32
    %149 = tpu.memref_slice %arg7[%c3_i32_62, %c0_i32_65] : memref<8x32xf32, #tpu.memory_space<vmem>> -> memref<1x32xf32, #tpu.memory_space<vmem>>
    %150 = tpu.memref_squeeze %149 : memref<1x32xf32, #tpu.memory_space<vmem>> -> memref<32xf32, #tpu.memory_space<vmem>>
    %151 = tpu.memref_slice %arg8[%c3_i32_63] : memref<8x!tpu.dma_semaphore, #tpu.memory_space<semaphore_mem>> -> memref<1x!tpu.dma_semaphore, #tpu.memory_space<semaphore_mem>>
    %152 = tpu.memref_squeeze %151 : memref<1x!tpu.dma_semaphore, #tpu.memory_space<semaphore_mem>> -> memref<!tpu.dma_semaphore, #tpu.memory_space<semaphore_mem>>
    tpu.wait_dma2 semaphore(%152 : memref<!tpu.dma_semaphore, #tpu.memory_space<semaphore_mem>>) src(%148 : memref<32xf32, #tpu.memory_space<any>>) dst(%150 : memref<32xf32, #tpu.memory_space<vmem>>)
    %c4_i32_66 = arith.constant 4 : i32
    %c4_i32_67 = arith.constant 4 : i32
    %c0_i32_68 = arith.constant 0 : i32
    %153 = tpu.memref_slice %arg4[%28, %c0_i32_68] : memref<32x32xf32, #tpu.memory_space<any>> -> memref<1x32xf32, #tpu.memory_space<any>>
    %154 = tpu.memref_squeeze %153 : memref<1x32xf32, #tpu.memory_space<any>> -> memref<32xf32, #tpu.memory_space<any>>
    %c0_i32_69 = arith.constant 0 : i32
    %155 = tpu.memref_slice %arg7[%c4_i32_66, %c0_i32_69] : memref<8x32xf32, #tpu.memory_space<vmem>> -> memref<1x32xf32, #tpu.memory_space<vmem>>
    %156 = tpu.memref_squeeze %155 : memref<1x32xf32, #tpu.memory_space<vmem>> -> memref<32xf32, #tpu.memory_space<vmem>>
    %157 = tpu.memref_slice %arg8[%c4_i32_67] : memref<8x!tpu.dma_semaphore, #tpu.memory_space<semaphore_mem>> -> memref<1x!tpu.dma_semaphore, #tpu.memory_space<semaphore_mem>>
    %158 = tpu.memref_squeeze %157 : memref<1x!tpu.dma_semaphore, #tpu.memory_space<semaphore_mem>> -> memref<!tpu.dma_semaphore, #tpu.memory_space<semaphore_mem>>
    tpu.wait_dma2 semaphore(%158 : memref<!tpu.dma_semaphore, #tpu.memory_space<semaphore_mem>>) src(%154 : memref<32xf32, #tpu.memory_space<any>>) dst(%156 : memref<32xf32, #tpu.memory_space<vmem>>)
    %c5_i32_70 = arith.constant 5 : i32
    %c5_i32_71 = arith.constant 5 : i32
    %c0_i32_72 = arith.constant 0 : i32
    %159 = tpu.memref_slice %arg4[%35, %c0_i32_72] : memref<32x32xf32, #tpu.memory_space<any>> -> memref<1x32xf32, #tpu.memory_space<any>>
    %160 = tpu.memref_squeeze %159 : memref<1x32xf32, #tpu.memory_space<any>> -> memref<32xf32, #tpu.memory_space<any>>
    %c0_i32_73 = arith.constant 0 : i32
    %161 = tpu.memref_slice %arg7[%c5_i32_70, %c0_i32_73] : memref<8x32xf32, #tpu.memory_space<vmem>> -> memref<1x32xf32, #tpu.memory_space<vmem>>
    %162 = tpu.memref_squeeze %161 : memref<1x32xf32, #tpu.memory_space<vmem>> -> memref<32xf32, #tpu.memory_space<vmem>>
    %163 = tpu.memref_slice %arg8[%c5_i32_71] : memref<8x!tpu.dma_semaphore, #tpu.memory_space<semaphore_mem>> -> memref<1x!tpu.dma_semaphore, #tpu.memory_space<semaphore_mem>>
    %164 = tpu.memref_squeeze %163 : memref<1x!tpu.dma_semaphore, #tpu.memory_space<semaphore_mem>> -> memref<!tpu.dma_semaphore, #tpu.memory_space<semaphore_mem>>
    tpu.wait_dma2 semaphore(%164 : memref<!tpu.dma_semaphore, #tpu.memory_space<semaphore_mem>>) src(%160 : memref<32xf32, #tpu.memory_space<any>>) dst(%162 : memref<32xf32, #tpu.memory_space<vmem>>)
    %c6_i32_74 = arith.constant 6 : i32
    %c6_i32_75 = arith.constant 6 : i32
    %c0_i32_76 = arith.constant 0 : i32
    %165 = tpu.memref_slice %arg4[%42, %c0_i32_76] : memref<32x32xf32, #tpu.memory_space<any>> -> memref<1x32xf32, #tpu.memory_space<any>>
    %166 = tpu.memref_squeeze %165 : memref<1x32xf32, #tpu.memory_space<any>> -> memref<32xf32, #tpu.memory_space<any>>
    %c0_i32_77 = arith.constant 0 : i32
    %167 = tpu.memref_slice %arg7[%c6_i32_74, %c0_i32_77] : memref<8x32xf32, #tpu.memory_space<vmem>> -> memref<1x32xf32, #tpu.memory_space<vmem>>
    %168 = tpu.memref_squeeze %167 : memref<1x32xf32, #tpu.memory_space<vmem>> -> memref<32xf32, #tpu.memory_space<vmem>>
    %169 = tpu.memref_slice %arg8[%c6_i32_75] : memref<8x!tpu.dma_semaphore, #tpu.memory_space<semaphore_mem>> -> memref<1x!tpu.dma_semaphore, #tpu.memory_space<semaphore_mem>>
    %170 = tpu.memref_squeeze %169 : memref<1x!tpu.dma_semaphore, #tpu.memory_space<semaphore_mem>> -> memref<!tpu.dma_semaphore, #tpu.memory_space<semaphore_mem>>
    tpu.wait_dma2 semaphore(%170 : memref<!tpu.dma_semaphore, #tpu.memory_space<semaphore_mem>>) src(%166 : memref<32xf32, #tpu.memory_space<any>>) dst(%168 : memref<32xf32, #tpu.memory_space<vmem>>)
    %c7_i32_78 = arith.constant 7 : i32
    %c7_i32_79 = arith.constant 7 : i32
    %c0_i32_80 = arith.constant 0 : i32
    %171 = tpu.memref_slice %arg4[%49, %c0_i32_80] : memref<32x32xf32, #tpu.memory_space<any>> -> memref<1x32xf32, #tpu.memory_space<any>>
    %172 = tpu.memref_squeeze %171 : memref<1x32xf32, #tpu.memory_space<any>> -> memref<32xf32, #tpu.memory_space<any>>
    %c0_i32_81 = arith.constant 0 : i32
    %173 = tpu.memref_slice %arg7[%c7_i32_78, %c0_i32_81] : memref<8x32xf32, #tpu.memory_space<vmem>> -> memref<1x32xf32, #tpu.memory_space<vmem>>
    %174 = tpu.memref_squeeze %173 : memref<1x32xf32, #tpu.memory_space<vmem>> -> memref<32xf32, #tpu.memory_space<vmem>>
    %175 = tpu.memref_slice %arg8[%c7_i32_79] : memref<8x!tpu.dma_semaphore, #tpu.memory_space<semaphore_mem>> -> memref<1x!tpu.dma_semaphore, #tpu.memory_space<semaphore_mem>>
    %176 = tpu.memref_squeeze %175 : memref<1x!tpu.dma_semaphore, #tpu.memory_space<semaphore_mem>> -> memref<!tpu.dma_semaphore, #tpu.memory_space<semaphore_mem>>
    tpu.wait_dma2 semaphore(%176 : memref<!tpu.dma_semaphore, #tpu.memory_space<semaphore_mem>>) src(%172 : memref<32xf32, #tpu.memory_space<any>>) dst(%174 : memref<32xf32, #tpu.memory_space<vmem>>)
    %c0_82 = arith.constant 0 : index
    %c0_83 = arith.constant 0 : index
    %177 = vector.load %arg7[%c0_82, %c0_83] : memref<8x32xf32, #tpu.memory_space<vmem>>, vector<8x32xf32>
    %178 = vector.extract_strided_slice %56 {offsets = [0, 0], sizes = [8, 32], strides = [1, 1]} : vector<8x128xf32> to vector<8x32xf32>
    %179 = arith.subf %178, %177 : vector<8x32xf32>
    %180 = arith.mulf %179, %179 : vector<8x32xf32>
    %181 = vector.shape_cast %180 : vector<8x32xf32> to vector<1x8x32xf32>
    %cst_84 = arith.constant dense<0.000000e+00> : vector<1xf32>
    %182 = vector.multi_reduction <add>, %181, %cst_84 [1, 2] : vector<1x8x32xf32> to vector<1xf32>
    %183 = vector.shape_cast %182 : vector<1xf32> to vector<1x1x1xf32>
    %184 = vector.extract %183[0, 0, 0] : f32 from vector<1x1x1xf32>
    %cst_85 = arith.constant 2.560000e+02 : f32
    %185 = arith.divf %184, %cst_85 : f32
    %c0_86 = arith.constant 0 : index
    %c0_87 = arith.constant 0 : index
    %186 = memref.load %arg5[%c0_86, %c0_87] : memref<1x1xf32, #tpu.memory_space<smem>>
    memref.store %128, %arg5[%c0_86, %c0_87] : memref<1x1xf32, #tpu.memory_space<smem>>
    %cst_88 = arith.constant 3.000000e-03 : f32
    %187 = arith.mulf %cst_88, %185 : f32
    %188 = arith.addf %114, %187 : f32
    %c0_89 = arith.constant 0 : index
    %c0_90 = arith.constant 0 : index
    %189 = memref.load %arg6[%c0_89, %c0_90] : memref<1x1xf32, #tpu.memory_space<smem>>
    memref.store %188, %arg6[%c0_89, %c0_90] : memref<1x1xf32, #tpu.memory_space<smem>>
    return
  }
}

</mosaic_0001>

<bundles_post_ra>
// kernel: tpu_custom_call.1
= control target key start
LH: loop header
LB: loop body
LE: loop exit
PB: predicated region body
PF: predicated region fallthrough
CT: control target
= control target key end

     0   :  { %12 = vsyncpa [#allocation5], 0  ;;  %s1276_s0 = inlined_call_operand.hbm [shape: f32[8,128], index: 0, kind: input, shape index: {}]   ;;  %s1277_s1 = inlined_call_operand.hbm [shape: f32[128,128], index: 1, kind: input, shape index: {}]   ;;  %s1278_s2 = inlined_call_operand.hbm [shape: s32[8,1], index: 2, kind: input, shape index: {}]   ;;  %s1279_s3 = inlined_call_operand.hbm [shape: s32[8], index: 3, kind: input, shape index: {}]   ;;  %s1280_s4 = inlined_call_operand.hbm [shape: f32[32,32], index: 4, kind: input, shape index: {}]   ;;  %s1281_s5 = inlined_call_operand.hbm [shape: f32[1,1], index: 5, kind: output, shape index: {0}]   ;;  %s1282_s6 = inlined_call_operand.hbm [shape: f32[1,1], index: 6, kind: output, shape index: {1}]  }
   0x1   :  { %13 = vsyncpa [#allocation9], 0 }
   0x2   :  { %14 = vsyncpa [#allocation6], 0 }
   0x3   :  { %15 = vsyncpa [#allocation7], 0 }
   0x4   :  { %16 = vsyncpa [#allocation14], 0  ;;  %s990_s21 = smov [#allocation8]   ;;  %s676_s25 = scalar_lea.hbm %s1277_s1, 2048 }
   0x5   :  { %s32_s22 = sshll.u32 %s990_s21, 4  ;;  %p677_p0 = scmp.ne.s32.totalorder %s1277_s1, %s676_s25  ;;  %s33_s22 = int_to_ptr.vmem [resolvable:$true] %s32_s22 }
   0x6   :  { %p680_p1 = scmp.lt.u32.totalorder %s676_s25, %s1277_s1 }
   0x8   :  { %p682_p2 = pnand %p680_p1, %p677_p0 }
   0xa   :  { %685 = shalt.err (!%p682_p2)
}
   0xb   :  { %s686_s30 = scalar_lea.vmem %s33_s22, 2048  ;;  %p691_p4 = scmp.lt.s32.totalorder %s33_s22, %s33_s22 }
   0xc   :  { %p687_p3 = scmp.ne.s32.totalorder %s33_s22, %s686_s30  ;;  %p692_p5 = scmp.lt.s32.totalorder %s686_s30, %s686_s30 }
   0xe   :  { %p693_p6 = por %p692_p5, %p691_p4 }
  0x10   :  { %p694_p7 = pnand %p693_p6, %p687_p3 }
  0x12   :  { %697 = shalt.err (!%p694_p7)
}
  0x13   :  { %s991_s7 = smov 128   ;;  %s992_s8 = smov 8  }
  0x14   :  { %38 = dma.hbm_to_vmem [thread:$0]  %s1277_s1, 2048, %s33_s22, [#allocation9], %s991_s7, %s991_s7, %s992_s8  }
  0x15   :  { %s993_s11 = smov [#allocation4]   ;;  %s994_s13 = smov [#allocation10]  }
  0x16   :  { %s23_s12 = sshll.u32 %s993_s11, 4  ;;  %s45_s14 = sshll.u32 %s994_s13, 4  ;;  %s24_s12 = int_to_ptr.vmem [resolvable:$true] %s23_s12  ;;  %s46_s14 = int_to_ptr.vmem [resolvable:$true] %s45_s14 }
  0x17   :  { %s698_s17 = scalar_lea.hbm %s1276_s0, 128 }
  0x18   :  { %p699_p8 = scmp.ne.s32.totalorder %s1276_s0, %s698_s17  ;;  %p702_p9 = scmp.lt.u32.totalorder %s698_s17, %s1276_s0 }
  0x1a   :  { %p704_p10 = pnand %p702_p9, %p699_p8 }
  0x1c   :  { %707 = shalt.err (!%p704_p10)
}
  0x1d   :  { %s708_s1 = scalar_lea.vmem %s24_s12, 128  ;;  %p713_p12 = scmp.lt.s32.totalorder %s24_s12, %s24_s12 }
  0x1e   :  { %p709_p11 = scmp.ne.s32.totalorder %s24_s12, %s708_s1  ;;  %p714_p13 = scmp.lt.s32.totalorder %s708_s1, %s708_s1 }
  0x20   :  { %p715_p0 = por %p714_p13, %p713_p12 }
  0x22   :  { %p716_p1 = pnand %p715_p0, %p709_p11 }
  0x24   :  { %719 = shalt.err (!%p716_p1)
}
  0x25   :  { %26 = dma.hbm_to_vmem [thread:$0]  %s1276_s0, 128, %s24_s12, [#allocation5]  }
  0x26   :  { %s720_s26 = scalar_lea.hbm %s1278_s2, 128 }
  0x27   :  { %p721_p2 = scmp.ne.s32.totalorder %s1278_s2, %s720_s26  ;;  %p724_p3 = scmp.lt.u32.totalorder %s720_s26, %s1278_s2 }
  0x29   :  { %p726_p4 = pnand %p724_p3, %p721_p2 }
  0x2b   :  { %729 = shalt.err (!%p726_p4)
}
  0x2c   :  { %s730_s7 = scalar_lea.vmem %s46_s14, 128  ;;  %p735_p6 = scmp.lt.s32.totalorder %s46_s14, %s46_s14 }
  0x2d   :  { %p731_p5 = scmp.ne.s32.totalorder %s46_s14, %s730_s7  ;;  %p736_p7 = scmp.lt.s32.totalorder %s730_s7, %s730_s7 }
  0x2f   :  { %p737_p8 = por %p736_p7, %p735_p6 }
  0x31   :  { %p738_p9 = pnand %p737_p8, %p731_p5 }
  0x33   :  { %741 = shalt.err (!%p738_p9)
}
  0x34   :  { %48 = dma.hbm_to_vmem [thread:$0]  %s1278_s2, 128, %s46_s14, [#allocation9]  }
  0x35   :  { %s742_s11 = scalar_lea.hbm %s1279_s3, 16 }
  0x36   :  { %p743_p10 = scmp.ne.s32.totalorder %s1279_s3, %s742_s11  ;;  %p746_p11 = scmp.lt.u32.totalorder %s742_s11, %s1279_s3 }
  0x38   :  { %p748_p12 = pnand %p746_p11, %p743_p10 }
  0x3a   :  { %751 = shalt.err (!%p748_p12)
}
  0x3b   :  { %s995_s17 = smov [#allocation11]  }
  0x3c   :  { %56 = dma.hbm_to_smem %s1279_s3, 16, %s995_s17, [#allocation6]  }
  0x3d   :  { %964 = dma.done.wait [#allocation5], 128  }
  0x3e   :  { %965 = vsyncadd [#allocation5], 4294967168 }
  0x3f   :  { %966 = dma.done.wait [#allocation9], 2176  }
  0x40   :  { %967 = vsyncadd [#allocation9], 4294965120 }
  0x41   :  { %968 = dma.done.wait [#allocation6], 16  }
  0x42   :  { %969 = vsyncadd [#allocation6], 4294967280 }
  0x43   :  { %69 = sfence }
  0x44   :  { %v197_v0 = vld [vmem:[#allocation8] sm:$0xff]  ;;  %v198_v1 = vld [vmem:[#allocation8 + $0x8] sm:$0xff]  ;;  %v199_v2 = vld [vmem:[#allocation8 + $0x10] sm:$0xff]  ;;  %v996_v3 = vmov 0.0|0.0   ;;  %vm997_vm0 = vmmov 0   ;;  %v998_v9 = vmov 0.0  }
  0x45   :  { %616 = vmatprep.subr.bf16.mxu0 %v996_v3  ;;  %v221_v4 = vmul.f32 %v197_v0, %v197_v0  ;;  %v222_v5 = vmul.f32 %v198_v1, %v198_v1  ;;  %v617_v6 = vpack.c.bf16 %v198_v1, %v197_v0  ;;  %v200_v7 = vld [vmem:[#allocation8 + $0x18] sm:$0xff]  ;;  %v223_v8 = vmul.f32 %v199_v2, %v199_v2  ;;  %v201_v13 = vld [vmem:[#allocation8 + $0x20] sm:$0xff]  ;;  %v202_v14 = vld [vmem:[#allocation8 + $0x28] sm:$0xff]  ;;  %s70_s2 = sld [smem:[#allocation11]]  ;;  %s1001_s3 = smov [#allocation2]  }
  0x46   :  { %613 = vmatprep.mubr.msk.f32.mxu0 %vm997_vm0, %v998_v9  ;;  %v224_v11 = vmul.f32 %v200_v7, %v200_v7  ;;  %v620_v12 = vpack.c.bf16 %v200_v7, %v199_v2  ;;  %v225_v16 = vmul.f32 %v201_v13, %v201_v13  ;;  %v1097_v17 = vld [vmem:[#allocation4] sm:$0xff]  ;;  %v226_v19 = vmul.f32 %v202_v14, %v202_v14  ;;  %v203_v22 = vld [vmem:[#allocation8 + $0x30] sm:$0xff]  ;;  %v205_v30 = vld [vmem:[#allocation8 + $0x40] sm:$0xff]  ;;  %s80_s14 = sshll.u32 %s1001_s3, 4  ;;  %s1118_s20 = sld [smem:[#allocation11 + $0x1]]  ;;  %s1120_s14 = int_to_ptr.vmem [resolvable:$true] %s80_s14 }
  0x47   :  { %v237_v10 = vadd.f32 %v222_v5, %v221_v4  ;;  %618 = vmatpush3.bf16.msra.mxu0 %v617_v6  ;;  %v623_v20 = vpack.c.bf16 %v202_v14, %v201_v13  ;;  %v217_v21 = vmul.f32 %v1097_v17, %v1097_v17  ;;  %v204_v23 = vld [vmem:[#allocation8 + $0x38] sm:$0xff]  ;;  %v227_v25 = vmul.f32 %v203_v22, %v203_v22  ;;  %v206_v31 = vld [vmem:[#allocation8 + $0x48] sm:$0xff]  ;;  %v207_v37 = vld [vmem:[#allocation8 + $0x50] sm:$0xff]  ;;  %s1002_s21 = smov [#allocation2 + $0x1]   ;;  %s1122_s22 = sld [smem:[#allocation11 + $0x2]] }
  0x48   :  { %619 = vmatprep.subr.bf16.mxu0 %v996_v3  ;;  %v999_v26 = vmov 0   ;;  %v228_v28 = vmul.f32 %v204_v23, %v204_v23  ;;  %v626_v29 = vpack.c.bf16 %v204_v23, %v203_v22  ;;  %v229_v33 = vmul.f32 %v205_v30, %v205_v30  ;;  %v208_v38 = vld [vmem:[#allocation8 + $0x58] sm:$0xff]  ;;  %v209_v44 = vld [vmem:[#allocation8 + $0x60] sm:$0xff]  ;;  %v210_v45 = vld [vmem:[#allocation8 + $0x68] sm:$0xff]  ;;  %s96_s1 = sshll.u32 %s1002_s21, 4  ;;  %s1003_s23 = smov [#allocation2 + $0x2]   ;;  %s1124_s1 = int_to_ptr.vmem [resolvable:$true] %s96_s1 }
  0x49   :  { %v238_v15 = vadd.f32 %v237_v10, %v223_v8  ;;  %218 = vadd.xlane.f32.xlu0 %v217_v21  ;;  %v230_v35 = vmul.f32 %v206_v31, %v206_v31  ;;  %v629_v36 = vpack.c.bf16 %v206_v31, %v205_v30  ;;  %v231_v40 = vmul.f32 %v207_v37, %v207_v37  ;;  %v211_v51 = vld [vmem:[#allocation8 + $0x70] sm:$0xff]  ;;  %v212_v52 = vld [vmem:[#allocation8 + $0x78] sm:$0xff]  ;;  %v1107_v58 = vld [vmem:[#allocation10] sm:$0xff]  ;;  %s112_s24 = sshll.u32 %s1003_s23, 4  ;;  %s1126_s25 = sld [smem:[#allocation11 + $0x3]]  ;;  %s1128_s24 = int_to_ptr.vmem [resolvable:$true] %s112_s24 }
  0x4a   :  { %667 = vset.pattern.permute.xlu0 %v999_v26  ;;  %v232_v42 = vmul.f32 %v208_v38, %v208_v38  ;;  %v632_v43 = vpack.c.bf16 %v208_v38, %v207_v37  ;;  %v233_v47 = vmul.f32 %v209_v44, %v209_v44  ;;  %v234_v49 = vmul.f32 %v210_v45, %v210_v45  ;;  %s1137_s9 = scalar_lea.hbm %s1280_s4, 512 }
  0x4b   :  { %v239_v18 = vadd.f32 %v238_v15, %v224_v11  ;;  %621 = vmatpush3.bf16.msra.mxu0 %v620_v12  ;;  %v635_v50 = vpack.c.bf16 %v210_v45, %v209_v44  ;;  %v235_v54 = vmul.f32 %v211_v51, %v211_v51  ;;  %v236_v56 = vmul.f32 %v212_v52, %v212_v52  ;;  %s539_s26 = sshll.u32 %s70_s2, 4 }
  0x4c   :  { %622 = vmatprep.subr.bf16.mxu0 %v996_v3  ;;  %v638_v57 = vpack.c.bf16 %v212_v52, %v211_v51  ;;  %v214_v0 = vlaneseq  ;;  %v1000_v6 = vmov 1.0   ;;  %vm357_vm5 = vcmask 7168   ;;  %s72_s29 = scalar_lea.hbm %s1280_s4, %s539_s26  ;;  %s541_s30 = sshll.u32 %s1118_s20, 4 }
  0x4d   :  { %v240_v24 = vadd.f32 %v239_v18, %v225_v16  ;;  %s752_s7 = scalar_lea.hbm %s72_s29, 16  ;;  %p755_p0 = scmp.lt.u32.totalorder %s72_s29, %s1280_s4 }
  0x4e   :  { %v215_v2 = vand.u32 127, %v214_v0  ;;  %p753_p13 = scmp.ne.s32.totalorder %s72_s29, %s752_s7  ;;  %p756_p1 = scmp.lt.u32.totalorder %s1137_s9, %s752_s7 }
  0x4f   :  { %v241_v27 = vadd.f32 %v240_v24, %v226_v19  ;;  %624 = vmatpush3.bf16.msra.mxu0 %v623_v20  ;;  %p758_p3 = scmp.lt.u32.totalorder %s752_s7, %s72_s29 }
  0x50   :  { %625 = vmatprep.subr.bf16.mxu0 %v996_v3  ;;  %vm216_vm1 = vcmp.lt.s32.totalorder %v215_v2, 32  ;;  %p757_p2 = por %p756_p1, %p755_p0 }
  0x51   :  { %v242_v32 = vadd.f32 %v241_v27, %v227_v25 }
  0x52   :  { %p759_p4 = por %p758_p3, %p757_p2 }
  0x53   :  { %v243_v34 = vadd.f32 %v242_v32, %v228_v28  ;;  %627 = vmatpush3.bf16.msra.mxu0 %v626_v29 }
  0x54   :  { %628 = vmatprep.subr.bf16.mxu0 %v996_v3  ;;  %p760_p5 = pnand %p759_p4, %p753_p13 }
  0x55   :  { %v244_v39 = vadd.f32 %v243_v34, %v229_v33 }
  0x57   :  { %v245_v41 = vadd.f32 %v244_v39, %v230_v35  ;;  %630 = vmatpush3.bf16.msra.mxu0 %v629_v36 }
  0x58   :  { %631 = vmatprep.subr.bf16.mxu0 %v996_v3 }
  0x59   :  { %v246_v46 = vadd.f32 %v245_v41, %v231_v40 }
  0x5b   :  { %v247_v48 = vadd.f32 %v246_v46, %v232_v42  ;;  %633 = vmatpush3.bf16.msra.mxu0 %v632_v43 }
  0x5c   :  { %634 = vmatprep.subr.bf16.mxu0 %v996_v3 }
  0x5d   :  { %v248_v53 = vadd.f32 %v247_v48, %v233_v47 }
  0x5f   :  { %v249_v55 = vadd.f32 %v248_v53, %v234_v49  ;;  %636 = vmatpush3.bf16.msra.mxu0 %v635_v50  ;;  %334 = vperm.xlu0 %667, %v1107_v58  }
  0x60   :  { %637 = vmatprep.subr.bf16.mxu0 %v996_v3  ;;  %v258_v3 = vsel %vm216_vm1, 0.0, %v1000_v6 }
  0x61   :  { %v250_v59 = vadd.f32 %v249_v55, %v235_v54 }
  0x63   :  { %v251_v60 = vadd.f32 %v250_v59, %v236_v56  ;;  %639 = vmatpush3.bf16.msra.mxu0 %v638_v57 }
  0x65   :  { %v252_v61 = vrot.slane %v251_v60, 4 }
  0x66   :  { %614 = vmatmul.mubr.f32.vlgmr.msra.gmra.mrb[0].mxu0 %v1097_v17 }
  0x67   :  { %v253_v62 = vadd.f32 %v252_v61, %v251_v60 }
  0x69   :  { %v254_v63 = vrot.slane %v253_v62, 2 }
  0x6b   :  { %v255_v1 = vadd.f32 %v254_v63, %v253_v62 }
  0x6d   :  { %v256_v4 = vrot.slane %v255_v1, 1 }
  0x6f   :  { %v257_v5 = vadd.f32 %v256_v4, %v255_v1 }
  0x71   :  { %v259_v8 = vadd.f32 %v258_v3, %v257_v5 }
  0xd6   :  { %v219_v7 = vpop.xlane.xlu0 %218 }
  0xd7   :  { %668 = vrsqrt.f32 %v219_v7 }
  0xd8   :  { %670 = vrsqrt.f32 %v259_v8 }
  0xde   :  { %v335_v11 = vpop.permute.xlu0 %334 }
  0xdf   :  { %vm336_vm2 = vcmp.eq.s32.totalorder %v215_v2, %v335_v11 }
  0xe0   :  { %v337_v18 = vsel %vm336_vm2, 10.5, %v998_v9 }
  0xe1   :  { %v669_v10 = vpop.eup %668 }
  0xe2   :  { %v671_v12 = vpop.eup %670 }
 0x139   :  { %v327_v13 = vpop.f32.mrb[0].mxu0 }
 0x13a   :  { %v331_v14 = vmul.f32 %v669_v10, %v327_v13  ;;  %v615_v15 = vpop.f32.mrb[1].mxu0 }
 0x13c   :  { %v332_v16 = vmul.f32 %v671_v12, %v331_v14 }
 0x13e   :  { %v338_v19 = vmul.f32 30.0, %v332_v16  ;;  %v351_v29 = vsel %vm336_vm2, %v332_v16, 0.0 }
 0x140   :  { %v339_v20 = vsub.f32 %v338_v19, %v337_v18 }
 0x142   :  { %v340_v21 = vsel %vm216_vm1, %v339_v20, -1e+30 }
 0x143   :  { %341 = vmax.xlane.f32.xlu1 %v340_v21 }
 0x1d0   :  { %v342_v22 = vpop.xlane.xlu1 %341 }
 0x1d1   :  { %v343_v23 = vsub.f32 %v340_v21, %v342_v22  ;;  %vm371_vm3 = vcmp.eq.f32.partialorder %v340_v21, %v342_v22 }
 0x1d2   :  { %v372_v24 = vsel %vm371_vm3, %v215_v2, 128 }
 0x1d3   :  { %v344_v25 = vmul.f32 1.442695, %v343_v23  ;;  %v374_v26 = vshra.s32 %v372_v24, 16  ;;  %v373_v30 = vand.u32 65535, %v372_v24 }
 0x1d5   :  { %672 = vpow2.f32 %v344_v25  ;;  %v376_v27 = vcvt.s32.f32 %v374_v26  ;;  %v375_v32 = vcvt.s32.f32 %v373_v30 }
 0x1d7   :  { %377 = vmin.xlane.f32.xlu1 %v376_v27 }
 0x1df   :  { %v673_v28 = vpop.eup %672 }
 0x1e0   :  { %346 = vadd.xlane.f32.xlu1 %v673_v28 }
 0x1e4   :  { %352 = vadd.xlane.f32.xlu1 %v351_v29 }
 0x264   :  { %v378_v31 = vpop.xlane.xlu1 %377 }
 0x265   :  { %vm379_vm4 = vcmp.eq.f32.partialorder %v376_v27, %v378_v31  ;;  %v384_v43 = vcvt.f32.s32 %v378_v31 }
 0x266   :  { %v380_v33 = vsel %vm379_vm4, %v375_v32, inf }
 0x267   :  { %381 = vmin.xlane.f32.xlu1 %v380_v33  ;;  %v385_v45 = vshll.u32 %v384_v43, 16 }
 0x26d   :  { %v347_v34 = vpop.xlane.xlu1 %346 }
 0x26e   :  { %674 = vlog2.f32 %v347_v34 }
 0x271   :  { %v353_v35 = vpop.xlane.xlu1 %352 }
 0x272   :  { %v554_v36 = vadd.f32 -0.35, %v353_v35 }
 0x274   :  { %v355_v39 = vmul.f32 30.0, %v554_v36 }
 0x278   :  { %v675_v37 = vpop.eup %674 }
 0x279   :  { %v349_v38 = vmul.f32 0.6931472, %v675_v37 }
 0x27b   :  { %v350_v40 = vadd.f32 %v349_v38, %v342_v22 }
 0x27d   :  { %v356_v41 = vsub.f32 %v350_v40, %v355_v39 }
 0x27f   :  { %v358_v42 = vsel %vm357_vm5, %v356_v41, 0.0 }
 0x280   :  { %359 = vadd.xlane.f32.xlu1 %v358_v42 }
 0x2f4   :  { %v382_v44 = vpop.xlane.xlu1 %381 }
 0x2f5   :  { %v383_v46 = vcvt.f32.s32 %v382_v44 }
 0x2f7   :  { %v386_v47 = vadd.s32 %v385_v45, %v383_v46 }
 0x2f9   :  { %vm387_vm6 = vcmp.eq.s32.totalorder %v386_v47, %v1107_v58 }
 0x2fa   :  { %v555_v48 = vsel %vm387_vm6, 1.0, %v998_v9 }
 0x2fb   :  { %v390_v49 = vsel %vm357_vm5, %v555_v48, 0.0 }
 0x2fc   :  { %391 = vadd.xlane.f32.xlu1 %v390_v49 }
 0x30d   :  { %v360_v50 = vpop.xlane.xlu1 %359 }
 0x30e   :  { %v361_v51 = vrot.slane %v360_v50, 4 }
 0x310   :  { %v362_v52 = vadd.f32 %v361_v51, %v360_v50 }
 0x312   :  { %v363_v53 = vrot.slane %v362_v52, 2 }
 0x314   :  { %v364_v54 = vadd.f32 %v363_v53, %v362_v52 }
 0x316   :  { %v365_v55 = vrot.slane %v364_v54, 1 }
 0x318   :  { %v366_v56 = vadd.f32 %v365_v55, %v364_v54 }
 0x31a   :  { %640 = vpush %v366_v56 }
 0x31b   :  { %763 = shalt.err (!%p760_p5)  }
 0x31c   :  { %s764_s12 = scalar_lea.vmem %s1120_s14, 16  ;;  %s1146_s13 = scalar_lea.vmem %s1120_s14, 128 }
 0x31d   :  { %p765_p6 = scmp.ne.s32.totalorder %s1120_s14, %s764_s12  ;;  %p769_p7 = scmp.lt.s32.totalorder %s1120_s14, %s1120_s14 }
 0x31e   :  { %p770_p8 = scmp.lt.s32.totalorder %s1146_s13, %s764_s12 }
 0x320   :  { %p771_p9 = por %p770_p8, %p769_p7 }
 0x322   :  { %p772_p10 = pnand %p771_p9, %p765_p6 }
 0x324   :  { %775 = shalt.err (!%p772_p10)  }
 0x325   :  { %83 = dma.hbm_to_vmem [thread:$0]  %s72_s29, 16, %s1120_s14, [#allocation3] }
 0x326   :  { %s86_s17 = scalar_lea.hbm %s1280_s4, %s541_s30  ;;  %s543_s18 = sshll.u32 %s1122_s22, 4 }
 0x327   :  { %s776_s19 = scalar_lea.hbm %s86_s17, 16  ;;  %p779_p12 = scmp.lt.u32.totalorder %s86_s17, %s1280_s4 }
 0x328   :  { %p777_p11 = scmp.ne.s32.totalorder %s86_s17, %s776_s19  ;;  %p780_p13 = scmp.lt.u32.totalorder %s1137_s9, %s776_s19 }
 0x329   :  { %p782_p1 = scmp.lt.u32.totalorder %s776_s19, %s86_s17 }
 0x32a   :  { %p781_p0 = por %p780_p13, %p779_p12 }
 0x32c   :  { %p783_p2 = por %p782_p1, %p781_p0 }
 0x32e   :  { %p784_p3 = pnand %p783_p2, %p777_p11 }
 0x330   :  { %787 = shalt.err (!%p784_p3)  }
 0x331   :  { %s788_s20 = scalar_lea.vmem %s1124_s1, 16  ;;  %p793_p5 = scmp.lt.s32.totalorder %s1124_s1, %s1120_s14 }
 0x332   :  { %p789_p4 = scmp.ne.s32.totalorder %s1124_s1, %s788_s20  ;;  %p794_p6 = scmp.lt.s32.totalorder %s1146_s13, %s788_s20 }
 0x334   :  { %p795_p7 = por %p794_p6, %p793_p5 }
 0x336   :  { %p796_p8 = pnand %p795_p7, %p789_p4 }
 0x338   :  { %799 = shalt.err (!%p796_p8)  }
 0x339   :  { %99 = dma.hbm_to_vmem [thread:$0]  %s86_s17, 16, %s1124_s1, [#allocation3 + $0x1] }
 0x33a   :  { %s102_s23 = scalar_lea.hbm %s1280_s4, %s543_s18  ;;  %s545_s26 = sshll.u32 %s1126_s25, 4 }
 0x33b   :  { %s800_s27 = scalar_lea.hbm %s102_s23, 16  ;;  %p803_p10 = scmp.lt.u32.totalorder %s102_s23, %s1280_s4 }
 0x33c   :  { %p801_p9 = scmp.ne.s32.totalorder %s102_s23, %s800_s27  ;;  %p804_p11 = scmp.lt.u32.totalorder %s1137_s9, %s800_s27 }
 0x33d   :  { %p806_p13 = scmp.lt.u32.totalorder %s800_s27, %s102_s23 }
 0x33e   :  { %p805_p12 = por %p804_p11, %p803_p10 }
 0x340   :  { %p807_p0 = por %p806_p13, %p805_p12 }
 0x342   :  { %p808_p1 = pnand %p807_p0, %p801_p9 }
 0x344   :  { %811 = shalt.err (!%p808_p1)  }
 0x345   :  { %s812_s1 = scalar_lea.vmem %s1128_s24, 16  ;;  %p817_p3 = scmp.lt.s32.totalorder %s1128_s24, %s1120_s14 }
 0x346   :  { %p813_p2 = scmp.ne.s32.totalorder %s1128_s24, %s812_s1  ;;  %p818_p4 = scmp.lt.s32.totalorder %s1146_s13, %s812_s1 }
 0x348   :  { %p819_p5 = por %p818_p4, %p817_p3 }
 0x34a   :  { %p820_p6 = pnand %p819_p5, %p813_p2 }
 0x34c   :  { %823 = shalt.err (!%p820_p6)  }
 0x34d   :  { %115 = dma.hbm_to_vmem [thread:$0]  %s102_s23, 16, %s1128_s24, [#allocation3 + $0x2] }
 0x34e   :  { %s118_s7 = scalar_lea.hbm %s1280_s4, %s545_s26  ;;  %s1004_s0 = smov [#allocation2 + $0x3]  }
 0x34f   :  { %s128_s8 = sshll.u32 %s1004_s0, 4  ;;  %s1183_s10 = sld [smem:[#allocation11 + $0x4]]  ;;  %s129_s8 = int_to_ptr.vmem [resolvable:$true] %s128_s8 }
 0x350   :  { %s824_s11 = scalar_lea.hbm %s118_s7, 16  ;;  %p827_p8 = scmp.lt.u32.totalorder %s118_s7, %s1280_s4 }
 0x351   :  { %p825_p7 = scmp.ne.s32.totalorder %s118_s7, %s824_s11  ;;  %p828_p9 = scmp.lt.u32.totalorder %s1137_s9, %s824_s11 }
 0x352   :  { %p830_p11 = scmp.lt.u32.totalorder %s824_s11, %s118_s7 }
 0x353   :  { %p829_p10 = por %p828_p9, %p827_p8 }
 0x355   :  { %p831_p12 = por %p830_p11, %p829_p10 }
 0x357   :  { %p832_p13 = pnand %p831_p12, %p825_p7 }
 0x359   :  { %835 = shalt.err (!%p832_p13)  }
 0x35a   :  { %s836_s24 = scalar_lea.vmem %s129_s8, 16  ;;  %p841_p1 = scmp.lt.s32.totalorder %s129_s8, %s1120_s14 }
 0x35b   :  { %p837_p0 = scmp.ne.s32.totalorder %s129_s8, %s836_s24  ;;  %p842_p2 = scmp.lt.s32.totalorder %s1146_s13, %s836_s24 }
 0x35d   :  { %p843_p3 = por %p842_p2, %p841_p1 }
 0x35f   :  { %p844_p4 = pnand %p843_p3, %p837_p0 }
 0x361   :  { %847 = shalt.err (!%p844_p4)  }
 0x362   :  { %131 = dma.hbm_to_vmem [thread:$0]  %s118_s7, 16, %s129_s8, [#allocation3 + $0x3] }
 0x363   :  { %s1005_s16 = smov [#allocation2 + $0x4]   ;;  %s1191_s18 = sld [smem:[#allocation11 + $0x5]] }
 0x364   :  { %s144_s17 = sshll.u32 %s1005_s16, 4  ;;  %s1006_s19 = smov [#allocation2 + $0x5]   ;;  %s145_s17 = int_to_ptr.vmem [resolvable:$true] %s144_s17 }
 0x365   :  { %s160_s2 = sshll.u32 %s1006_s19, 4  ;;  %s1193_s3 = sld [smem:[#allocation11 + $0x6]]  ;;  %s1196_s2 = int_to_ptr.vmem [resolvable:$true] %s160_s2 }
 0x366   :  { %s547_s20 = sshll.u32 %s1183_s10, 4 }
 0x367   :  { %s134_s23 = scalar_lea.hbm %s1280_s4, %s547_s20 }
 0x368   :  { %s848_s26 = scalar_lea.hbm %s134_s23, 16  ;;  %p851_p6 = scmp.lt.u32.totalorder %s134_s23, %s1280_s4 }
 0x369   :  { %p849_p5 = scmp.ne.s32.totalorder %s134_s23, %s848_s26  ;;  %p852_p7 = scmp.lt.u32.totalorder %s1137_s9, %s848_s26 }
 0x36a   :  { %p854_p9 = scmp.lt.u32.totalorder %s848_s26, %s134_s23 }
 0x36b   :  { %p853_p8 = por %p852_p7, %p851_p6 }
 0x36d   :  { %p855_p10 = por %p854_p9, %p853_p8 }
 0x36f   :  { %p856_p11 = pnand %p855_p10, %p849_p5 }
 0x371   :  { %859 = shalt.err (!%p856_p11)  }
 0x372   :  { %s860_s29 = scalar_lea.vmem %s145_s17, 16  ;;  %p865_p13 = scmp.lt.s32.totalorder %s145_s17, %s1120_s14 }
 0x373   :  { %p861_p12 = scmp.ne.s32.totalorder %s145_s17, %s860_s29  ;;  %p866_p0 = scmp.lt.s32.totalorder %s1146_s13, %s860_s29 }
 0x375   :  { %p867_p1 = por %p866_p0, %p865_p13 }
 0x377   :  { %p868_p2 = pnand %p867_p1, %p861_p12 }
 0x379   :  { %871 = shalt.err (!%p868_p2)  }
 0x37a   :  { %147 = dma.hbm_to_vmem [thread:$0]  %s134_s23, 16, %s145_s17, [#allocation3 + $0x4] }
 0x37b   :  { %s549_s1 = sshll.u32 %s1191_s18, 4  ;;  %s1007_s25 = smov [#allocation2 + $0x6]  }
 0x37c   :  { %s176_s30 = sshll.u32 %s1007_s25, 4  ;;  %s150_s8 = scalar_lea.hbm %s1280_s4, %s549_s1  ;;  %s1211_s30 = int_to_ptr.vmem [resolvable:$true] %s176_s30 }
 0x37d   :  { %s872_s10 = scalar_lea.hbm %s150_s8, 16  ;;  %p875_p4 = scmp.lt.u32.totalorder %s150_s8, %s1280_s4 }
 0x37e   :  { %p873_p3 = scmp.ne.s32.totalorder %s150_s8, %s872_s10  ;;  %p876_p5 = scmp.lt.u32.totalorder %s1137_s9, %s872_s10 }
 0x37f   :  { %p878_p7 = scmp.lt.u32.totalorder %s872_s10, %s150_s8 }
 0x380   :  { %p877_p6 = por %p876_p5, %p875_p4 }
 0x382   :  { %p879_p8 = por %p878_p7, %p877_p6 }
 0x384   :  { %p880_p9 = pnand %p879_p8, %p873_p3 }
 0x386   :  { %883 = shalt.err (!%p880_p9)  }
 0x387   :  { %s884_s15 = scalar_lea.vmem %s1196_s2, 16  ;;  %p889_p11 = scmp.lt.s32.totalorder %s1196_s2, %s1120_s14 }
 0x388   :  { %p885_p10 = scmp.ne.s32.totalorder %s1196_s2, %s884_s15  ;;  %p890_p12 = scmp.lt.s32.totalorder %s1146_s13, %s884_s15 }
 0x38a   :  { %p891_p13 = por %p890_p12, %p889_p11 }
 0x38c   :  { %p892_p0 = pnand %p891_p13, %p885_p10 }
 0x38e   :  { %895 = shalt.err (!%p892_p0)  }
 0x38f   :  { %163 = dma.hbm_to_vmem [thread:$0]  %s150_s8, 16, %s1196_s2, [#allocation3 + $0x5] }
 0x390   :  { %s551_s24 = sshll.u32 %s1193_s3, 4 }
 0x391   :  { %s166_s18 = scalar_lea.hbm %s1280_s4, %s551_s24 }
 0x392   :  { %s896_s19 = scalar_lea.hbm %s166_s18, 16  ;;  %p899_p2 = scmp.lt.u32.totalorder %s166_s18, %s1280_s4 }
 0x393   :  { %p897_p1 = scmp.ne.s32.totalorder %s166_s18, %s896_s19  ;;  %p900_p3 = scmp.lt.u32.totalorder %s1137_s9, %s896_s19 }
 0x394   :  { %p902_p5 = scmp.lt.u32.totalorder %s896_s19, %s166_s18 }
 0x395   :  { %p901_p4 = por %p900_p3, %p899_p2 }
 0x397   :  { %p903_p6 = por %p902_p5, %p901_p4 }
 0x399   :  { %p904_p7 = pnand %p903_p6, %p897_p1 }
 0x39b   :  { %907 = shalt.err (!%p904_p7)  }
 0x39c   :  { %s908_s2 = scalar_lea.vmem %s1211_s30, 16  ;;  %p913_p9 = scmp.lt.s32.totalorder %s1211_s30, %s1120_s14 }
 0x39d   :  { %p909_p8 = scmp.ne.s32.totalorder %s1211_s30, %s908_s2  ;;  %p914_p10 = scmp.lt.s32.totalorder %s1146_s13, %s908_s2 }
 0x39f   :  { %p915_p11 = por %p914_p10, %p913_p9 }
 0x3a1   :  { %p916_p12 = pnand %p915_p11, %p909_p8 }
 0x3a3   :  { %919 = shalt.err (!%p916_p12)  }
 0x3a4   :  { %179 = dma.hbm_to_vmem [thread:$0]  %s166_s18, 16, %s1211_s30, [#allocation3 + $0x6] }
 0x3a5   :  { %s552_s3 = sld [smem:[#allocation11 + $0x7]]  ;;  %s1008_s23 = smov [#allocation2 + $0x7]  }
 0x3a6   :  { %s192_s26 = sshll.u32 %s1008_s23, 4  ;;  %s193_s26 = int_to_ptr.vmem [resolvable:$true] %s192_s26 }
 0x3ab   :  { %s553_s22 = sshll.u32 %s552_s3, 4 }
 0x3ac   :  { %s182_s29 = scalar_lea.hbm %s1280_s4, %s553_s22 }
 0x3ad   :  { %s920_s1 = scalar_lea.hbm %s182_s29, 16  ;;  %p923_p0 = scmp.lt.u32.totalorder %s182_s29, %s1280_s4 }
 0x3ae   :  { %p921_p13 = scmp.ne.s32.totalorder %s182_s29, %s920_s1  ;;  %p924_p1 = scmp.lt.u32.totalorder %s1137_s9, %s920_s1 }
 0x3af   :  { %p926_p3 = scmp.lt.u32.totalorder %s920_s1, %s182_s29 }
 0x3b0   :  { %p925_p2 = por %p924_p1, %p923_p0 }
 0x3b2   :  { %p927_p4 = por %p926_p3, %p925_p2 }
 0x3b4   :  { %p928_p5 = pnand %p927_p4, %p921_p13 }
 0x3b6   :  { %931 = shalt.err (!%p928_p5)  }
 0x3b7   :  { %s932_s30 = scalar_lea.vmem %s193_s26, 16  ;;  %p937_p7 = scmp.lt.s32.totalorder %s193_s26, %s1120_s14 }
 0x3b8   :  { %p933_p6 = scmp.ne.s32.totalorder %s193_s26, %s932_s30  ;;  %p938_p8 = scmp.lt.s32.totalorder %s1146_s13, %s932_s30 }
 0x3ba   :  { %p939_p9 = por %p938_p8, %p937_p7 }
 0x3bc   :  { %p940_p10 = pnand %p939_p9, %p933_p6 }
 0x3be   :  { %943 = shalt.err (!%p940_p10)  }
 0x3bf   :  { %195 = dma.hbm_to_vmem [thread:$0]  %s182_s29, 16, %s193_s26, [#allocation3 + $0x7]  ;;  %v392_v9 = vpop.xlane.xlu1 %391 }
 0x3c0   :  { %s1246_s0 = spop %640  ;;  %v393_v57 = vrot.slane %v392_v9, 4 }
 0x3c1   :  { %s370_s4 = smul.f32 0.125, %s1246_s0 }
 0x3c2   :  { %v394_v58 = vadd.f32 %v393_v57, %v392_v9 }
 0x3c4   :  { %v395_v59 = vrot.slane %v394_v58, 2 }
 0x3c6   :  { %v396_v60 = vadd.f32 %v395_v59, %v394_v58 }
 0x3c8   :  { %v397_v61 = vrot.slane %v396_v60, 1 }
 0x3ca   :  { %v398_v62 = vadd.f32 %v397_v61, %v396_v60 }
 0x3cc   :  { %642 = vpush %v398_v62 }
 0x3fd   :  { %s643_s9 = spop %642 }
 0x3fe   :  { %s400_s8 = smul.f32 12.5, %s643_s9 }
 0x3ff   :  { %970 = dma.done.wait [#allocation3], 16 }
 0x400   :  { %971 = vsyncadd [#allocation3], 4294967280 }
 0x401   :  { %972 = dma.done.wait [#allocation3 + $0x1], 16 }
 0x402   :  { %973 = vsyncadd [#allocation3 + $0x1], 4294967280 }
 0x403   :  { %974 = dma.done.wait [#allocation3 + $0x2], 16 }
 0x404   :  { %975 = vsyncadd [#allocation3 + $0x2], 4294967280 }
 0x405   :  { %976 = dma.done.wait [#allocation3 + $0x3], 16 }
 0x406   :  { %977 = vsyncadd [#allocation3 + $0x3], 4294967280 }
 0x407   :  { %978 = dma.done.wait [#allocation3 + $0x4], 16 }
 0x408   :  { %979 = vsyncadd [#allocation3 + $0x4], 4294967280 }
 0x409   :  { %980 = dma.done.wait [#allocation3 + $0x5], 16 }
 0x40a   :  { %981 = vsyncadd [#allocation3 + $0x5], 4294967280 }
 0x40b   :  { %982 = dma.done.wait [#allocation3 + $0x6], 16 }
 0x40c   :  { %983 = vsyncadd [#allocation3 + $0x6], 4294967280 }
 0x40d   :  { %984 = dma.done.wait [#allocation3 + $0x7], 16 }
 0x40e   :  { %985 = vsyncadd [#allocation3 + $0x7], 4294967280  ;;  %435 = sst [smem:[#allocation12]] %s400_s8  ;;  %v417_v63 = vld [vmem:[#allocation2] sm:$0xff]  ;;  %vm420_vm7 = vcmask 261120   ;;  %s944_s10 = scalar_lea.hbm %s1281_s5, 16 }
 0x40f   :  { %v418_v0 = vsub.f32 %v1097_v17, %v417_v63  ;;  %p945_p11 = scmp.ne.s32.totalorder %s1281_s5, %s944_s10  ;;  %p948_p12 = scmp.lt.u32.totalorder %s944_s10, %s1281_s5 }
 0x411   :  { %v419_v1 = vmul.f32 %v418_v0, %v418_v0  ;;  %p950_p13 = pnand %p948_p12, %p945_p11 }
 0x413   :  { %v421_v2 = vsel %vm420_vm7, %v419_v1, 0.0 }
 0x414   :  { %422 = vadd.xlane.f32.xlu0 %v421_v2 }
 0x415   :  { %953 = shalt.err (!%p950_p13)
}
 0x416   :  { %s1009_s16 = smov [#allocation12]   ;;  %s954_s23 = scalar_lea.hbm %s1282_s6, 16 }
 0x417   :  { %447 = dma.smem_to_hbm %s1009_s16, 16, %s1281_s5, [#allocation7]  }
 0x418   :  { %p955_p0 = scmp.ne.s32.totalorder %s1282_s6, %s954_s23  ;;  %p958_p1 = scmp.lt.u32.totalorder %s954_s23, %s1282_s6 }
 0x41a   :  { %p960_p2 = pnand %p958_p1, %p955_p0 }
 0x4a1   :  { %v423_v17 = vpop.xlane.xlu0 %422 }
 0x4a2   :  { %v424_v4 = vrot.slane %v423_v17, 4 }
 0x4a4   :  { %v425_v5 = vadd.f32 %v424_v4, %v423_v17 }
 0x4a6   :  { %v426_v6 = vrot.slane %v425_v5, 2 }
 0x4a8   :  { %v427_v3 = vadd.f32 %v426_v6, %v425_v5 }
 0x4aa   :  { %v428_v7 = vrot.slane %v427_v3, 1 }
 0x4ac   :  { %v429_v8 = vadd.f32 %v428_v7, %v427_v3 }
 0x4ae   :  { %644 = vpush %v429_v8 }
 0x4df   :  { %s645_s19 = spop %644 }
 0x4e0   :  { %s433_s20 = smul.f32 0.00390625, %s645_s19 }
 0x4e2   :  { %s436_s21 = smul.f32 0.003, %s433_s20 }
 0x4e4   :  { %s437_s2 = sadd.f32 %s436_s21, %s370_s4 }
 0x4e6   :  { %439 = sst [smem:[#allocation13]] %s437_s2 }
 0x4e7   :  { %963 = shalt.err (!%p960_p2)
}
 0x4e8   :  { %s1010_s29 = smov [#allocation13]  }
 0x4e9   :  { %455 = dma.smem_to_hbm %s1010_s29, 16, %s1282_s6, [#allocation14]  }
 0x4ea   :  { %986 = dma.done.wait [#allocation7], 16  }
 0x4eb   :  { %987 = vsyncadd [#allocation7], 4294967280 }
 0x4ec   :  { %988 = dma.done.wait [#allocation14], 16  }
 0x4ed   :  { %989 = vsyncadd [#allocation14], 4294967280 }
 0x4ee   :  { %462 = sfence }
 0x4ef   :  { %463 = vsyncpa [#allocation5], 1 }
 0x4f0   :  { %464 = vsyncpa [#allocation9], 1 }
 0x4f1   :  { %465 = vsyncpa [#allocation6], 1 }
 0x4f2   :  { %466 = vsyncpa [#allocation7], 1 }
 0x4f3   :  { %467 = vsyncpa [#allocation14], 1 }
 0x4f4   :  { %468 = vsyncmov [#allocation3] }
 0x4f7   :  { %s469_s7 = vpop.sfrf %468 }
 0x4f8   :  { %p556_p3 = scmp.ne.s32.totalorder %s469_s7, 0 }
 0x4fa   :  { %473 = shalt.err (%p556_p3)  }
 0x4fb   :  { %475 = vsyncmov [#allocation3 + $0x1] }
 0x4fe   :  { %s476_s30 = vpop.sfrf %475 }
 0x4ff   :  { %p557_p4 = scmp.ne.s32.totalorder %s476_s30, 0 }
 0x501   :  { %480 = shalt.err (%p557_p4)  }
 0x502   :  { %482 = vsyncmov [#allocation3 + $0x2] }
 0x505   :  { %s483_s6 = vpop.sfrf %482 }
 0x506   :  { %p558_p5 = scmp.ne.s32.totalorder %s483_s6, 0 }
 0x508   :  { %487 = shalt.err (%p558_p5)  }
 0x509   :  { %489 = vsyncmov [#allocation3 + $0x3] }
 0x50c   :  { %s490_s0 = vpop.sfrf %489 }
 0x50d   :  { %p559_p6 = scmp.ne.s32.totalorder %s490_s0, 0 }
 0x50f   :  { %494 = shalt.err (%p559_p6)  }
 0x510   :  { %496 = vsyncmov [#allocation3 + $0x4] }
 0x513   :  { %s497_s4 = vpop.sfrf %496 }
 0x514   :  { %p560_p7 = scmp.ne.s32.totalorder %s497_s4, 0 }
 0x516   :  { %501 = shalt.err (%p560_p7)  }
 0x517   :  { %503 = vsyncmov [#allocation3 + $0x5] }
 0x51a   :  { %s504_s9 = vpop.sfrf %503 }
 0x51b   :  { %p561_p8 = scmp.ne.s32.totalorder %s504_s9, 0 }
 0x51d   :  { %508 = shalt.err (%p561_p8)  }
 0x51e   :  { %510 = vsyncmov [#allocation3 + $0x6] }
 0x521   :  { %s511_s8 = vpop.sfrf %510 }
 0x522   :  { %p562_p9 = scmp.ne.s32.totalorder %s511_s8, 0 }
 0x524   :  { %515 = shalt.err (%p562_p9)  }
 0x525   :  { %517 = vsyncmov [#allocation3 + $0x7] }
 0x528   :  { %s518_s14 = vpop.sfrf %517 }
 0x529   :  { %p563_p10 = scmp.ne.s32.totalorder %s518_s14, 0 }
 0x52b   :  { %522 = shalt.err (%p563_p10)  }

</bundles_post_ra>
